<compile_context>
chip_gen: v6e
topology: v6e:2x2x1
jax: 0.10.0
libtpu: 0.0.40
codegen_flags: <defaults>
</compile_context>

<pallas_src>
import jax
import jax.numpy as jnp
from jax.experimental import pallas as pl
from jax.experimental.pallas import tpu as pltpu


def _h_sigmoid_kernel(x_ref, o_ref):
    x = x_ref[...]
    # ReLU6(x + 3) / 6 == clamp(x + 3, 0, 6) / 6
    o_ref[...] = (jnp.clip(x + 3.0, 0.0, 6.0) / 6.0).astype(o_ref.dtype)


def _round_up(a: int, b: int) -> int:
    return (a + b - 1) // b * b


def h_sigmoid(x: jax.Array, *,
              target_block_bytes: int = 8 << 20,   # ~8 MiB blocks (v7x sweet spot)
              min_block_bytes: int = 1 << 20,      # never shrink blocks below ~1 MiB
              min_grid_steps: int = 8,             # keep both v7x TCs + pipeline busy
              donate_input: bool = False) -> jax.Array:
    """Elementwise hard-sigmoid: relu6(x + 3) / 6. Layout-agnostic (flattens)."""
    orig_shape = x.shape
    dtype = x.dtype
    assert jnp.issubdtype(dtype, jnp.floating), "h_sigmoid expects a float dtype"
    total = int(x.size)

    itemsize = jnp.dtype(dtype).itemsize
    # Sublane pack: 8 rows for 32-bit, 16 for 16-bit, 32 for 8-bit dtypes.
    sub = max(8, 32 // itemsize)

    # Pick a lane-dense width that divides the element count exactly (no pad).
    cols = None
    for c in (1024, 512, 256, 128):
        if total % c == 0:
            cols = c
            break
    if cols is None:
        # Ragged size: pad only to the next multiple of cols (<= cols-1 elems).
        cols = 1024 if total >= 1024 else 128
    padded_total = _round_up(total, cols)
    needs_pad = padded_total != total
    rows = padded_total // cols

    # Tile rows: aim for ~target_block_bytes, but guarantee >= min_grid_steps
    # grid steps on medium inputs and never go below ~min_block_bytes blocks.
    row_bytes = cols * itemsize
    tile_target = max(sub, (target_block_bytes // row_bytes) // sub * sub)
    tile_floor = max(sub, (min_block_bytes // row_bytes) // sub * sub)
    tile_for_steps = _round_up(pl.cdiv(rows, min_grid_steps), sub)
    tile_rows = min(tile_target, max(tile_floor, tile_for_steps))
    tile_rows = min(tile_rows, _round_up(rows, sub))   # don't over-pad tiny inputs
    tile_rows = max(tile_rows, sub)

    grid = (pl.cdiv(rows, tile_rows),)   # ragged final block handled by Pallas

    flat = x.reshape(-1)
    if needs_pad:
        flat = jnp.pad(flat, (0, padded_total - total))
    x2d = flat.reshape(rows, cols)

    tile_bytes = tile_rows * cols * itemsize
    # ~2 double-buffered input + 2 output tiles resident; cap well inside
    # v7x's 64 MiB physical VMEM, and above v5e's 16 MiB scoped default.
    vmem_limit = min(48 << 20, max(32 << 20, 5 * tile_bytes))

    # Only alias when explicitly donated (padded temp is safe to donate too).
    alias = {0: 0} if (donate_input or needs_pad) else {}

    out2d = pl.pallas_call(
        _h_sigmoid_kernel,
        out_shape=jax.ShapeDtypeStruct((rows, cols), dtype),
        grid_spec=pltpu.PrefetchScalarGridSpec(
            num_scalar_prefetch=0,
            grid=grid,
            in_specs=[pl.BlockSpec((tile_rows, cols), lambda i: (i, 0))],
            out_specs=pl.BlockSpec((tile_rows, cols), lambda i: (i, 0)),
        ),
        compiler_params=pltpu.CompilerParams(
            dimension_semantics=("parallel",),
            vmem_limit_bytes=vmem_limit,
        ),
        cost_estimate=pl.CostEstimate(
            flops=5 * total,
            transcendentals=0,
            bytes_accessed=2 * total * itemsize,
        ),
        input_output_aliases=alias,
    )(x2d)

    if needs_pad:
        return out2d.reshape(-1)[:total].reshape(orig_shape)
    return out2d.reshape(orig_shape)


def h_sigmoid_ref(x: jax.Array) -> jax.Array:
    return jnp.clip(x + 3.0, 0.0, 6.0) / 6.0


if __name__ == "__main__":
    key = jax.random.PRNGKey(0)

    # NCHW, same convention as the PyTorch module. Divides the lane width ->
    # zero-copy wrapper path (no pad, no slice-back).
    x = jax.random.normal(key, (2, 4, 16, 16), dtype=jnp.float32) * 4.0
    y = h_sigmoid(x)
    jax.block_until_ready(y)
    y_ref = h_sigmoid_ref(x)
    assert y.shape == x.shape and y.dtype == x.dtype
    assert jnp.allclose(y, y_ref, atol=1e-6, rtol=1e-6)

    # Awkward shape: exercises the minimal-pad + masked-boundary-block path.
    x2 = jax.random.normal(jax.random.PRNGKey(1), (3, 5, 17, 13),
                           dtype=jnp.float32) * 4.0
    y2 = h_sigmoid(x2)
    jax.block_until_ready(y2)
    assert y2.shape == x2.shape and y2.dtype == x2.dtype
    assert jnp.allclose(y2, h_sigmoid_ref(x2), atol=1e-6, rtol=1e-6)

    # bf16 path (16-row sublane pack).
    x3 = jax.random.normal(jax.random.PRNGKey(2), (2, 8, 32, 32),
                           dtype=jnp.bfloat16)
    y3 = h_sigmoid(x3)
    jax.block_until_ready(y3)
    assert y3.shape == x3.shape and y3.dtype == x3.dtype
    assert jnp.allclose(y3.astype(jnp.float32),
                        h_sigmoid_ref(x3).astype(jnp.float32),
                        atol=1e-2, rtol=1e-2)

    print("KERNEL_OK")
</pallas_src>

<mosaic_0001>
module attributes {stable_mosaic.version = 11 : i64} {
  func.func @_h_sigmoid_kernel(%arg0: i32, %arg1: memref<8x1024xf32, #tpu.memory_space<vmem>>, %arg2: memref<8x1024xf32, #tpu.memory_space<vmem>>) attributes {dimension_semantics = [#tpu.dimension_semantics<parallel>], iteration_bounds = array<i64: 1>, scalar_prefetch = 0 : i64, scratch_operands = 0 : i64, tpu.core_type = #tpu.core_type<tc>, window_params = [{transform_indices = @transform_0, window_bounds = array<i64: 8, 1024>}, {transform_indices = @transform_1, window_bounds = array<i64: 8, 1024>}]} {
    %c0 = arith.constant 0 : index
    %c0_0 = arith.constant 0 : index
    %0 = vector.load %arg1[%c0, %c0_0] : memref<8x1024xf32, #tpu.memory_space<vmem>>, vector<8x1024xf32>
    %cst = arith.constant 3.000000e+00 : f32
    %1 = vector.broadcast %cst : f32 to vector<8x1024xf32>
    %2 = arith.addf %0, %1 : vector<8x1024xf32>
    %cst_1 = arith.constant 0.000000e+00 : f32
    %cst_2 = arith.constant 6.000000e+00 : f32
    %3 = vector.broadcast %cst_1 : f32 to vector<8x1024xf32>
    %4 = arith.maximumf %3, %2 : vector<8x1024xf32>
    %5 = vector.broadcast %cst_2 : f32 to vector<8x1024xf32>
    %6 = arith.minimumf %5, %4 : vector<8x1024xf32>
    %cst_3 = arith.constant 6.000000e+00 : f32
    %7 = vector.broadcast %cst_3 : f32 to vector<8x1024xf32>
    %8 = arith.divf %6, %7 : vector<8x1024xf32>
    %c0_4 = arith.constant 0 : index
    %c0_5 = arith.constant 0 : index
    %9 = vector.load %arg2[%c0_4, %c0_5] : memref<8x1024xf32, #tpu.memory_space<vmem>>, vector<8x1024xf32>
    tpu.vector_store %arg2[%c0_4, %c0_5], %8 {strides = array<i32>} : memref<8x1024xf32, #tpu.memory_space<vmem>>, vector<8x1024xf32>,
    return
  }
  func.func @transform_0(%arg0: i32) -> (i32, i32) {
    %c0_i32 = arith.constant 0 : i32
    %c0_i32_0 = arith.constant 0 : i32
    return %arg0, %c0_i32 : i32, i32
  }
  func.func @transform_1(%arg0: i32) -> (i32, i32) {
    %c0_i32 = arith.constant 0 : i32
    %c0_i32_0 = arith.constant 0 : i32
    return %arg0, %c0_i32 : i32, i32
  }
}

</mosaic_0001>

<bundles_post_ra>
// kernel: tpu_custom_call.1
= control target key start
LH: loop header
LB: loop body
LE: loop exit
PB: predicated region body
PF: predicated region fallthrough
CT: control target
= control target key end

     0   :  { %6 = vsyncpa [#allocation3], 0  ;;  %s163_s0 = inlined_call_operand.hbm [shape: f32[2,1024], index: 0, kind: input, shape index: {}]   ;;  %s164_s1 = inlined_call_operand.hbm [shape: f32[2,1024], index: 1, kind: output, shape index: {}]  }
   0x1   :  { %7 = vsyncpa [#allocation4], 0 }
   0x2   :  { %12 = vsyncadd [#allocation3], 768  ;;  %s137_s6 = smov [#allocation2]  }
   0x3   :  { %s13_s7 = sshll.u32 %s137_s6, 4  ;;  %s14_s7 = int_to_ptr.vmem [resolvable:$true] %s13_s7 }
   0x4   :  { %s101_s8 = scalar_lea.vmem %s14_s7, 256  ;;  %s105_s9 = scalar_lea.vmem %s14_s7, 1024 }
   0x5   :  { %p102_p0 = scmp.ne.s32.totalorder %s14_s7, %s101_s8  ;;  %p106_p1 = scmp.lt.s32.totalorder %s14_s7, %s14_s7 }
   0x6   :  { %p107_p2 = scmp.lt.s32.totalorder %s105_s9, %s101_s8 }
   0x8   :  { %p108_p3 = por %p107_p2, %p106_p1 }
   0xa   :  { %p109_p4 = pnand %p108_p3, %p102_p0 }
   0xc   :  { %112 = shalt.err (!%p109_p4)
}
   0xd   :  { %s138_s10 = smov 256   ;;  %s139_s11 = smov 16  }
   0xe   :  { %19 = dma.hbm_to_vmem [thread:$0]  %s163_s0, 256, %s14_s7, [#allocation3], %s138_s10, %s138_s10, %s139_s11  }
   0xf   :  { %133 = dma.done.wait [#allocation3], 1024  }
  0x10   :  { %134 = vsyncadd [#allocation3], 4294966272  ;;  %v23_v0 = vld [vmem:[#allocation2] sm:$0xff]  ;;  %v24_v1 = vld [vmem:[#allocation2 + $0x8] sm:$0xff] }
  0x11   :  { %v25_v2 = vld [vmem:[#allocation2 + $0x10] sm:$0xff]  ;;  %v31_v3 = vadd.f32 3.0, %v23_v0  ;;  %v32_v4 = vadd.f32 3.0, %v24_v1  ;;  %v26_v6 = vld [vmem:[#allocation2 + $0x18] sm:$0xff]  ;;  %v27_v7 = vld [vmem:[#allocation2 + $0x20] sm:$0xff] }
  0x12   :  { %v33_v5 = vadd.f32 3.0, %v25_v2  ;;  %v28_v8 = vld [vmem:[#allocation2 + $0x28] sm:$0xff]  ;;  %v34_v9 = vadd.f32 3.0, %v26_v6  ;;  %v35_v10 = vadd.f32 3.0, %v27_v7  ;;  %v29_v12 = vld [vmem:[#allocation2 + $0x30] sm:$0xff]  ;;  %v30_v13 = vld [vmem:[#allocation2 + $0x38] sm:$0xff] }
  0x13   :  { %v36_v11 = vadd.f32 3.0, %v28_v8  ;;  %v39_v14 = vmax.f32 %v31_v3, 0.0  ;;  %v40_v15 = vmax.f32 %v32_v4, 0.0  ;;  %v37_v17 = vadd.f32 3.0, %v29_v12 }
  0x14   :  { %v41_v16 = vmax.f32 %v33_v5, 0.0  ;;  %v42_v18 = vmax.f32 %v34_v9, 0.0  ;;  %v43_v19 = vmax.f32 %v35_v10, 0.0  ;;  %v38_v21 = vadd.f32 3.0, %v30_v13 }
  0x15   :  { %v44_v20 = vmax.f32 %v36_v11, 0.0  ;;  %v47_v22 = vmin.f32 %v39_v14, 6.0  ;;  %v48_v23 = vmin.f32 %v40_v15, 6.0  ;;  %v45_v25 = vmax.f32 %v37_v17, 0.0 }
  0x16   :  { %v49_v24 = vmin.f32 %v41_v16, 6.0  ;;  %v50_v26 = vmin.f32 %v42_v18, 6.0  ;;  %v51_v27 = vmin.f32 %v43_v19, 6.0  ;;  %v46_v29 = vmax.f32 %v38_v21, 0.0 }
  0x17   :  { %v52_v28 = vmin.f32 %v44_v20, 6.0  ;;  %v56_v30 = vmul.f32 0.16666667, %v47_v22  ;;  %v57_v31 = vmul.f32 0.16666667, %v48_v23  ;;  %v53_v36 = vmin.f32 %v45_v25, 6.0 }
  0x18   :  { %v58_v32 = vmul.f32 0.16666667, %v49_v24  ;;  %v59_v33 = vmul.f32 0.16666667, %v50_v26  ;;  %v60_v34 = vmul.f32 0.16666667, %v51_v27 }
  0x19   :  { %v61_v35 = vmul.f32 0.16666667, %v52_v28  ;;  %64 = vst [vmem:[#allocation5] sm:$0xff] %v56_v30  ;;  %65 = vst [vmem:[#allocation5 + $0x8] sm:$0xff] %v57_v31  ;;  %v54_v37 = vmin.f32 %v46_v29, 6.0 }
  0x1a   :  { %66 = vst [vmem:[#allocation5 + $0x10] sm:$0xff] %v58_v32  ;;  %67 = vst [vmem:[#allocation5 + $0x18] sm:$0xff] %v59_v33  ;;  %v62_v38 = vmul.f32 0.16666667, %v53_v36 }
  0x1b   :  { %68 = vst [vmem:[#allocation5 + $0x20] sm:$0xff] %v60_v34  ;;  %69 = vst [vmem:[#allocation5 + $0x28] sm:$0xff] %v61_v35  ;;  %v63_v39 = vmul.f32 0.16666667, %v54_v37 }
  0x1c   :  { %70 = vst [vmem:[#allocation5 + $0x30] sm:$0xff] %v62_v38 }
  0x1d   :  { %71 = vst [vmem:[#allocation5 + $0x38] sm:$0xff] %v63_v39 }
  0x1e   :  { %76 = vsyncadd [#allocation4], 768  ;;  %s140_s0 = smov [#allocation5]  }
  0x1f   :  { %s77_s14 = sshll.u32 %s140_s0, 4  ;;  %s78_s14 = int_to_ptr.vmem [resolvable:$true] %s77_s14 }
  0x20   :  { %s113_s15 = scalar_lea.vmem %s78_s14, 256  ;;  %s117_s16 = scalar_lea.vmem %s78_s14, 1024 }
  0x21   :  { %p114_p5 = scmp.ne.s32.totalorder %s78_s14, %s113_s15  ;;  %p118_p6 = scmp.lt.s32.totalorder %s78_s14, %s78_s14 }
  0x22   :  { %p119_p7 = scmp.lt.s32.totalorder %s117_s16, %s113_s15 }
  0x24   :  { %p120_p8 = por %p119_p7, %p118_p6 }
  0x26   :  { %p121_p9 = pnand %p120_p8, %p114_p5 }
  0x28   :  { %124 = shalt.err (!%p121_p9)
}
  0x29   :  { %83 = dma.vmem_to_hbm [thread:$0]  %s78_s14, 256, %s164_s1, [#allocation4], %s138_s10, %s138_s10, %s139_s11  }
  0x2a   :  { %135 = dma.done.wait [#allocation4], 1024  }
  0x2b   :  { %136 = vsyncadd [#allocation4], 4294966272 }
  0x2c   :  { %87 = vsyncpa [#allocation3], 1 }
  0x2d   :  { %88 = vsyncpa [#allocation4], 1 }

</bundles_post_ra>
